<compile_context>
chip_gen: v7x
topology: tpu7x:2x2x1
jax: 0.10.0
libtpu: 0.0.40
codegen_flags: <defaults>
</compile_context>

<pallas_src>
import functools
import math

import jax
import jax.numpy as jnp
from jax.experimental import pallas as pl
from jax.experimental.pallas import tpu as pltpu


def _round_up(v, m):
    return (v + m - 1) // m * m


def _pad2(a, rows, cols, dtype):
    a = jnp.asarray(a, dtype)
    return jnp.pad(a, ((0, rows - a.shape[0]), (0, cols - a.shape[1])))


_SINGLE_BUFFER_OK = None


def _single_buffering_supported():
    """Probe once whether pipeline_mode=pl.Buffered(1) compiles on this setup."""
    global _SINGLE_BUFFER_OK
    if _SINGLE_BUFFER_OK is None:
        try:
            def _k(x_ref, o_ref):
                o_ref[...] = x_ref[...] * 2.0

            f = pl.pallas_call(
                _k,
                out_shape=jax.ShapeDtypeStruct((8, 128), jnp.float32),
                grid=(2,),
                in_specs=[pl.BlockSpec((8, 128), lambda i: (0, 0),
                                       pipeline_mode=pl.Buffered(1))],
                out_specs=pl.BlockSpec((8, 128), lambda i: (0, 0)),
            )
            jax.block_until_ready(f(jnp.ones((8, 128), jnp.float32)))
            _SINGLE_BUFFER_OK = True
        except Exception:
            _SINGLE_BUFFER_OK = False
    return _SINGLE_BUFFER_OK


def fused_gcn_kernel(x_ref, w1_ref, b1_ref, w2_ref, b2_ref, adj_ref,
                     out_ref, s1_ref, s2_ref, *, use_relu, tile_n, adj_resident):
    """grid = (3, num_row_strips); phase is the outer (sequential) axis.

    phase 0: s1[strip]  = x[strip] @ W1^T + b1
    phase 1: s2[strip]  = relu(adj[strip] @ s1) @ W2^T + b2
    phase 2: out[strip] = adj[strip] @ s2
    """
    phase = pl.program_id(0)
    i = pl.program_id(1)
    row0 = pl.multiple_of(i * tile_n, tile_n)
    mm_dtype = s1_ref.dtype                 # bf16 (perf) or f32 (exactness)

    def adj_strip():
        if adj_resident:                    # static Python flag
            return adj_ref[pl.ds(row0, tile_n), :]
        return adj_ref[...]

    # ---------------- phase 0: layer-1 support, streamed over x strips ------
    @pl.when(phase == 0)
    def _support1():
        s1 = jnp.dot(x_ref[...], w1_ref[...],
                     preferred_element_type=jnp.float32)
        s1_ref[pl.ds(row0, tile_n), :] = (s1 + b1_ref[...]).astype(mm_dtype)

        @pl.when(i == 0)
        def _init_out():                    # single deterministic init; no
            out_ref[...] = jnp.zeros_like(out_ref)  # HBM writeback until phase 2

    # ---------------- phase 1: layer-1 aggregation + layer-2 support --------
    @pl.when(phase == 1)
    def _agg1_support2():
        h = jnp.dot(adj_strip(), s1_ref[...],
                    preferred_element_type=jnp.float32)
        if use_relu:
            h = jnp.maximum(h, 0.0)
        # TODO(synk): training-mode dropout (pltpu.prng_* mask) would go here;
        # inference mode -> identity.
        s2 = jnp.dot(h.astype(mm_dtype), w2_ref[...],
                     preferred_element_type=jnp.float32)
        s2_ref[pl.ds(row0, tile_n), :] = (s2 + b2_ref[...]).astype(mm_dtype)

    # ---------------- phase 2: layer-2 aggregation ---------------------------
    @pl.when(phase == 2)
    def _agg2():
        out_ref[...] = jnp.dot(adj_strip(), s2_ref[...],
                               preferred_element_type=jnp.float32
                               ).astype(out_ref.dtype)


def gcn_forward(x, adj, params, use_relu=True, *,
                matmul_dtype=jnp.bfloat16, tile_n=512, adj_resident=None):
    """Two-layer GCN forward (inference-mode dropout = identity)."""
    n, nfeat = x.shape
    w1, b1 = params["w1"], params["b1"]     # [nhid, nfeat], [nhid]
    w2, b2 = params["w2"], params["b2"]     # [nssf, nhid], [nssf]
    nhid, nssf = w1.shape[0], w2.shape[0]

    LANE = 128
    mm_bytes = jnp.dtype(matmul_dtype).itemsize
    sub_pack = 8 * max(1, 4 // mm_bytes)    # 8 rows (f32) / 16 rows (bf16)

    n_p = _round_up(n, LANE)                # lane-dense adj strips / adj cols
    f_p = _round_up(nfeat, LANE)
    h_p = _round_up(nhid, LANE)
    o_p = _round_up(nssf, LANE)

    # tile_n: multiple of the packed-sublane granule that divides n_p exactly.
    tn = max(sub_pack, min(int(tile_n), n_p) // sub_pack * sub_pack)
    while n_p % tn:
        tn -= sub_pack
    tile_n = tn
    num_strips = n_p // tile_n

    # Layout plumbing in the wrapper: zero-pad (exactness relies on zero pads),
    # pre-transpose W to [in, out], cast matmul operands; biases stay f32.
    x_p = _pad2(x, n_p, f_p, matmul_dtype)
    adj_p = _pad2(adj, n_p, n_p, matmul_dtype)
    w1t_p = _pad2(w1.T, f_p, h_p, matmul_dtype)
    w2t_p = _pad2(w2.T, h_p, o_p, matmul_dtype)
    b1_p = _pad2(b1.reshape(1, -1), 1, h_p, jnp.float32)
    b2_p = _pad2(b2.reshape(1, -1), 1, o_p, jnp.float32)

    # ---- generation-aware VMEM budget & adjacency residency decision -------
    try:
        vmem_cap = int(pltpu.get_tpu_info().vmem_capacity_bytes)
    except Exception:
        vmem_cap = 64 * 1024 * 1024         # conservative (v7x-sized) fallback
    vmem_budget = int(0.75 * vmem_cap)

    single_buf = _single_buffering_supported()
    cbuf = 1 if single_buf else 2           # buffers for constant-index operands
    fixed_bytes = (
        cbuf * (f_p * h_p + h_p * o_p) * mm_bytes      # W1^T, W2^T
        + cbuf * (h_p + o_p) * 4                       # b1, b2 (f32)
        + 2 * tile_n * f_p * mm_bytes                  # x strips (double-buffered)
        + 2 * tile_n * o_p * 4                         # out strips
        + (n_p * h_p + n_p * o_p) * mm_bytes           # s1 / s2 scratches
    )
    adj_res_bytes = cbuf * n_p * n_p * mm_bytes
    adj_strm_bytes = 2 * tile_n * n_p * mm_bytes
    if adj_resident is None:                # auto: resident iff it fits
        adj_resident = fixed_bytes + adj_res_bytes <= int(0.85 * vmem_budget)
    adj_bytes = adj_res_bytes if adj_resident else adj_strm_bytes
    vmem_limit = int(min(max(2 * (fixed_bytes + adj_bytes), 32 * 1024 * 1024),
                         vmem_budget))

    def _const_spec(shape):
        if single_buf:
            return pl.BlockSpec(shape, lambda p, i: (0, 0),
                                pipeline_mode=pl.Buffered(1))
        return pl.BlockSpec(shape, lambda p, i: (0, 0))

    last = num_strips - 1
    # x only read in phase 0; park the block index afterwards (no redundant DMA).
    x_spec = pl.BlockSpec((tile_n, f_p),
                          lambda p, i: (jnp.where(p == 0, i, last), 0))
    if adj_resident:
        adj_spec = _const_spec((n_p, n_p))
    else:
        # Streamed strips in phases 1/2; parked at strip 0 during phase 0 so the
        # prefetched block is exactly what phase-1 step 0 needs (no waste).
        adj_spec = pl.BlockSpec((tile_n, n_p),
                                lambda p, i: (jnp.where(p == 0, 0, i), 0))
    # Output is only meaningful in phase 2; park at block 0 before that so no
    # placeholder HBM writebacks occur.
    out_spec = pl.BlockSpec((tile_n, o_p),
                            lambda p, i: (jnp.where(p == 2, i, 0), 0))

    kernel = functools.partial(fused_gcn_kernel, use_relu=bool(use_relu),
                               tile_n=tile_n, adj_resident=bool(adj_resident))
    out_p = pl.pallas_call(
        kernel,
        out_shape=jax.ShapeDtypeStruct((n_p, o_p), jnp.float32),
        grid_spec=pltpu.PrefetchScalarGridSpec(
            num_scalar_prefetch=0,
            grid=(3, num_strips),
            in_specs=[
                x_spec,                      # x (streamed row strips, phase 0)
                _const_spec((f_p, h_p)),     # W1^T
                _const_spec((1, h_p)),       # b1 (f32)
                _const_spec((h_p, o_p)),     # W2^T
                _const_spec((1, o_p)),       # b2 (f32)
                adj_spec,                    # adj (resident or streamed strips)
            ],
            out_specs=out_spec,
            scratch_shapes=[
                pltpu.VMEM((n_p, h_p), matmul_dtype),   # s1 = x@W1^T + b1
                pltpu.VMEM((n_p, o_p), matmul_dtype),   # s2 = relu(adj@s1)@W2^T + b2
            ],
        ),
        # Both axes MUST stay "arbitrary": the strip axis feeds the shared
        # s1/s2 scratches and the phase axis carries their lifetime.
        # TODO(synk): v7x dual-TensorCore split of the strip axis would need
        # VMEM_SHARED scratches + a core barrier between phases.
        compiler_params=pltpu.CompilerParams(
            dimension_semantics=("arbitrary", "arbitrary"),
            vmem_limit_bytes=vmem_limit,
        ),
    )(x_p, w1t_p, b1_p, w2t_p, b2_p, adj_p)

    return out_p[:n, :nssf]


def init_params(key, nfeat, nhid, nclass, nssf):
    k1, k2, k3, k4, k5 = jax.random.split(key, 5)
    stdv1 = 1.0 / math.sqrt(nfeat)
    stdv2 = 1.0 / math.sqrt(nhid)
    return {
        "w1": jax.random.uniform(k1, (nhid, nfeat), jnp.float32, -stdv1, stdv1),
        "b1": jax.random.uniform(k2, (nhid,), jnp.float32, -stdv1, stdv1),
        "w2": jax.random.uniform(k3, (nssf, nhid), jnp.float32, -stdv2, stdv2),
        "b2": jax.random.uniform(k4, (nssf,), jnp.float32, -stdv2, stdv2),
        # unused in forward, kept for parity with the PyTorch module
        "subspace_filter": jax.random.normal(k5, (nssf, nclass), jnp.float32),
    }


def gcn_reference(x, adj, params, use_relu=True):
    h = adj @ (x @ params["w1"].T + params["b1"])
    if use_relu:
        h = jnp.maximum(h, 0.0)
    return adj @ (h @ params["w2"].T + params["b2"])


def _make_adj(key, n):
    a = (jax.random.uniform(key, (n, n)) < 0.2).astype(jnp.float32)
    a = jnp.minimum(a + a.T + jnp.eye(n, dtype=jnp.float32), 1.0)
    return a / jnp.sum(a, axis=1, keepdims=True)


if __name__ == "__main__":
    _single_buffering_supported()   # probe outside any jit trace

    # small shapes consistent with the module
    N, nfeat, nhid, nclass, nssf = 32, 16, 4, 8, 8
    sp_rate, dropout = 0.5, 0.5     # dropout inactive in inference mode

    key = jax.random.PRNGKey(0)
    kx, ka, kp = jax.random.split(key, 3)

    x = jax.random.normal(kx, (N, nfeat), jnp.float32)
    adj = _make_adj(ka, N)
    params = init_params(kp, nfeat, nhid, nclass, nssf)
    ref = gcn_reference(x, adj, params, use_relu=True)

    # 1) exactness: f32 matmul operands (adj auto-resident at this size)
    fwd_f32 = jax.jit(functools.partial(gcn_forward, matmul_dtype=jnp.float32))
    out_f32 = jax.block_until_ready(fwd_f32(x, adj, params))
    assert out_f32.shape == (N, nssf)
    assert jnp.allclose(out_f32, ref, atol=1e-4, rtol=1e-4), "f32 mismatch"

    # 2) perf config: bf16 matmul operands / bf16 scratches, f32 accumulation
    fwd_bf16 = jax.jit(functools.partial(gcn_forward, matmul_dtype=jnp.bfloat16))
    out_bf16 = jax.block_until_ready(fwd_bf16(x, adj, params))
    assert out_bf16.shape == (N, nssf)
    assert jnp.allclose(out_bf16, ref, atol=3e-2, rtol=3e-2), "bf16 mismatch"

    # 3) multi-strip path (3-phase grid over several row strips)
    N2 = 40
    x2 = jax.random.normal(jax.random.PRNGKey(1), (N2, nfeat), jnp.float32)
    adj2 = _make_adj(jax.random.PRNGKey(2), N2)
    ref2 = gcn_reference(x2, adj2, params, use_relu=True)
    out2 = gcn_forward(x2, adj2, params, matmul_dtype=jnp.float32, tile_n=16)
    out2 = jax.block_until_ready(out2)
    assert out2.shape == (N2, nssf)
    assert jnp.allclose(out2, ref2, atol=1e-4, rtol=1e-4), "tiled mismatch"

    # 4) streamed-adjacency fallback path (forced, multi-strip)
    out3 = gcn_forward(x2, adj2, params, matmul_dtype=jnp.float32, tile_n=16,
                       adj_resident=False)
    out3 = jax.block_until_ready(out3)
    assert out3.shape == (N2, nssf)
    assert jnp.allclose(out3, ref2, atol=1e-4, rtol=1e-4), "streamed mismatch"

    print("KERNEL_OK")
</pallas_src>

<mosaic_0001>
module attributes {stable_mosaic.version = 11 : i64} {
  func.func @_k(%arg0: i32, %arg1: memref<8x128xf32, #tpu.memory_space<vmem>>, %arg2: memref<8x128xf32, #tpu.memory_space<vmem>>) attributes {dimension_semantics = [#tpu.dimension_semantics<arbitrary>], iteration_bounds = array<i64: 2>, scalar_prefetch = 0 : i64, scratch_operands = 0 : i64, tpu.core_type = #tpu.core_type<tc>, window_params = [{pipeline_mode = #tpu.pipeline_mode<synchronous>, transform_indices = @transform_0, window_bounds = array<i64: 8, 128>}, {pipeline_mode = #tpu.pipeline_mode<synchronous>, transform_indices = @transform_1, window_bounds = array<i64: 8, 128>}]} {
    %c0 = arith.constant 0 : index
    %c0_0 = arith.constant 0 : index
    %0 = vector.load %arg1[%c0, %c0_0] : memref<8x128xf32, #tpu.memory_space<vmem>>, vector<8x128xf32>
    %cst = arith.constant 2.000000e+00 : f32
    %1 = vector.broadcast %cst : f32 to vector<8x128xf32>
    %2 = arith.mulf %0, %1 : vector<8x128xf32>
    %c0_1 = arith.constant 0 : index
    %c0_2 = arith.constant 0 : index
    %3 = vector.load %arg2[%c0_1, %c0_2] : memref<8x128xf32, #tpu.memory_space<vmem>>, vector<8x128xf32>
    tpu.vector_store %arg2[%c0_1, %c0_2], %2 {strides = array<i32>} : memref<8x128xf32, #tpu.memory_space<vmem>>, vector<8x128xf32>,
    return
  }
  func.func @transform_0(%arg0: i32) -> (i32, i32) {
    %c0_i32 = arith.constant 0 : i32
    %c0_i32_0 = arith.constant 0 : i32
    %c0_i32_1 = arith.constant 0 : i32
    return %c0_i32, %c0_i32_0 : i32, i32
  }
  func.func @transform_1(%arg0: i32) -> (i32, i32) {
    %c0_i32 = arith.constant 0 : i32
    %c0_i32_0 = arith.constant 0 : i32
    %c0_i32_1 = arith.constant 0 : i32
    return %c0_i32, %c0_i32_0 : i32, i32
  }
}

module attributes {stable_mosaic.version = 11 : i64} {
  func.func @fused_gcn_kernel(%arg0: i32, %arg1: i32, %arg2: memref<128x128xf32, #tpu.memory_space<vmem>>, %arg3: memref<128x128xf32, #tpu.memory_space<vmem>>, %arg4: memref<1x128xf32, #tpu.memory_space<vmem>>, %arg5: memref<128x128xf32, #tpu.memory_space<vmem>>, %arg6: memref<1x128xf32, #tpu.memory_space<vmem>>, %arg7: memref<128x128xf32, #tpu.memory_space<vmem>>, %arg8: memref<128x128xf32, #tpu.memory_space<vmem>>, %arg9: memref<128x128xf32, #tpu.memory_space<vmem>>, %arg10: memref<128x128xf32, #tpu.memory_space<vmem>>) attributes {dimension_semantics = [#tpu.dimension_semantics<arbitrary>, #tpu.dimension_semantics<arbitrary>], iteration_bounds = array<i64: 3, 1>, scalar_prefetch = 0 : i64, scratch_operands = 2 : i64, tpu.core_type = #tpu.core_type<tc>, window_params = [{transform_indices = @transform_0, window_bounds = array<i64: 128, 128>}, {pipeline_mode = #tpu.pipeline_mode<synchronous>, transform_indices = @transform_1, window_bounds = array<i64: 128, 128>}, {pipeline_mode = #tpu.pipeline_mode<synchronous>, transform_indices = @transform_2, window_bounds = array<i64: 1, 128>}, {pipeline_mode = #tpu.pipeline_mode<synchronous>, transform_indices = @transform_3, window_bounds = array<i64: 128, 128>}, {pipeline_mode = #tpu.pipeline_mode<synchronous>, transform_indices = @transform_4, window_bounds = array<i64: 1, 128>}, {pipeline_mode = #tpu.pipeline_mode<synchronous>, transform_indices = @transform_5, window_bounds = array<i64: 128, 128>}, {transform_indices = @transform_6, window_bounds = array<i64: 128, 128>}]} {
    %c128_i32 = arith.constant 128 : i32
    %0 = arith.muli %arg1, %c128_i32 : i32
    %1 = tpu.assume_multiple %0, 128 : i32
    %c0_i32 = arith.constant 0 : i32
    %2 = arith.cmpi eq, %arg0, %c0_i32 : i32
    %3 = arith.extui %2 : i1 to i32
    %c0_i32_0 = arith.constant 0 : i32
    %4 = arith.cmpi ne, %3, %c0_i32_0 : i32
    scf.if %4 {
      %c0 = arith.constant 0 : index
      %c0_3 = arith.constant 0 : index
      %11 = vector.load %arg2[%c0, %c0_3] : memref<128x128xf32, #tpu.memory_space<vmem>>, vector<128x128xf32>
      %c0_4 = arith.constant 0 : index
      %c0_5 = arith.constant 0 : index
      %12 = vector.load %arg3[%c0_4, %c0_5] : memref<128x128xf32, #tpu.memory_space<vmem>>, vector<128x128xf32>
      %cst = arith.constant dense<0.000000e+00> : vector<128x128xf32>
      %13 = tpu.matmul %11, %12, %cst {dimension_numbers = #tpu.dot_dimension_numbers<[1], [0], [0], [1], [0, 0, 1, 1], [], []>} : vector<128x128xf32>, vector<128x128xf32>, vector<128x128xf32> -> vector<128x128xf32>
      %c0_6 = arith.constant 0 : index
      %c0_7 = arith.constant 0 : index
      %14 = vector.load %arg4[%c0_6, %c0_7] : memref<1x128xf32, #tpu.memory_space<vmem>>, vector<1x128xf32>
      %15 = vector.broadcast %14 : vector<1x128xf32> to vector<128x128xf32>
      %16 = arith.addf %13, %15 : vector<128x128xf32>
      %17 = arith.index_cast %1 : i32 to index
      %c0_8 = arith.constant 0 : index
      %18 = vector.load %arg9[%17, %c0_8] : memref<128x128xf32, #tpu.memory_space<vmem>>, vector<128x128xf32>
      tpu.vector_store %arg9[%17, %c0_8], %16 {strides = array<i32>} : memref<128x128xf32, #tpu.memory_space<vmem>>, vector<128x128xf32>,
      %c0_i32_9 = arith.constant 0 : i32
      %19 = arith.cmpi eq, %arg1, %c0_i32_9 : i32
      %20 = arith.extui %19 : i1 to i32
      %c0_i32_10 = arith.constant 0 : i32
      %21 = arith.cmpi ne, %20, %c0_i32_10 : i32
      scf.if %21 {
        %cst_11 = arith.constant 0.000000e+00 : f32
        %22 = vector.broadcast %cst_11 : f32 to vector<128x128xf32>
        %c0_12 = arith.constant 0 : index
        %c0_13 = arith.constant 0 : index
        %23 = vector.load %arg8[%c0_12, %c0_13] : memref<128x128xf32, #tpu.memory_space<vmem>>, vector<128x128xf32>
        tpu.vector_store %arg8[%c0_12, %c0_13], %22 {strides = array<i32>} : memref<128x128xf32, #tpu.memory_space<vmem>>, vector<128x128xf32>,
      } else {
      }
    } else {
    }
    %c1_i32 = arith.constant 1 : i32
    %5 = arith.cmpi eq, %arg0, %c1_i32 : i32
    %6 = arith.extui %5 : i1 to i32
    %c0_i32_1 = arith.constant 0 : i32
    %7 = arith.cmpi ne, %6, %c0_i32_1 : i32
    scf.if %7 {
      %11 = arith.index_cast %1 : i32 to index
      %c0 = arith.constant 0 : index
      %12 = vector.load %arg7[%11, %c0] : memref<128x128xf32, #tpu.memory_space<vmem>>, vector<128x128xf32>
      %c0_3 = arith.constant 0 : index
      %c0_4 = arith.constant 0 : index
      %13 = vector.load %arg9[%c0_3, %c0_4] : memref<128x128xf32, #tpu.memory_space<vmem>>, vector<128x128xf32>
      %cst = arith.constant dense<0.000000e+00> : vector<128x128xf32>
      %14 = tpu.matmul %12, %13, %cst {dimension_numbers = #tpu.dot_dimension_numbers<[1], [0], [0], [1], [0, 0, 1, 1], [], []>} : vector<128x128xf32>, vector<128x128xf32>, vector<128x128xf32> -> vector<128x128xf32>
      %cst_5 = arith.constant 0.000000e+00 : f32
      %15 = vector.broadcast %cst_5 : f32 to vector<128x128xf32>
      %16 = arith.maximumf %14, %15 : vector<128x128xf32>
      %c0_6 = arith.constant 0 : index
      %c0_7 = arith.constant 0 : index
      %17 = vector.load %arg5[%c0_6, %c0_7] : memref<128x128xf32, #tpu.memory_space<vmem>>, vector<128x128xf32>
      %cst_8 = arith.constant dense<0.000000e+00> : vector<128x128xf32>
      %18 = tpu.matmul %16, %17, %cst_8 {dimension_numbers = #tpu.dot_dimension_numbers<[1], [0], [0], [1], [0, 0, 1, 1], [], []>} : vector<128x128xf32>, vector<128x128xf32>, vector<128x128xf32> -> vector<128x128xf32>
      %c0_9 = arith.constant 0 : index
      %c0_10 = arith.constant 0 : index
      %19 = vector.load %arg6[%c0_9, %c0_10] : memref<1x128xf32, #tpu.memory_space<vmem>>, vector<1x128xf32>
      %20 = vector.broadcast %19 : vector<1x128xf32> to vector<128x128xf32>
      %21 = arith.addf %18, %20 : vector<128x128xf32>
      %22 = arith.index_cast %1 : i32 to index
      %c0_11 = arith.constant 0 : index
      %23 = vector.load %arg10[%22, %c0_11] : memref<128x128xf32, #tpu.memory_space<vmem>>, vector<128x128xf32>
      tpu.vector_store %arg10[%22, %c0_11], %21 {strides = array<i32>} : memref<128x128xf32, #tpu.memory_space<vmem>>, vector<128x128xf32>,
    } else {
    }
    %c2_i32 = arith.constant 2 : i32
    %8 = arith.cmpi eq, %arg0, %c2_i32 : i32
    %9 = arith.extui %8 : i1 to i32
    %c0_i32_2 = arith.constant 0 : i32
    %10 = arith.cmpi ne, %9, %c0_i32_2 : i32
    scf.if %10 {
      %11 = arith.index_cast %1 : i32 to index
      %c0 = arith.constant 0 : index
      %12 = vector.load %arg7[%11, %c0] : memref<128x128xf32, #tpu.memory_space<vmem>>, vector<128x128xf32>
      %c0_3 = arith.constant 0 : index
      %c0_4 = arith.constant 0 : index
      %13 = vector.load %arg10[%c0_3, %c0_4] : memref<128x128xf32, #tpu.memory_space<vmem>>, vector<128x128xf32>
      %cst = arith.constant dense<0.000000e+00> : vector<128x128xf32>
      %14 = tpu.matmul %12, %13, %cst {dimension_numbers = #tpu.dot_dimension_numbers<[1], [0], [0], [1], [0, 0, 1, 1], [], []>} : vector<128x128xf32>, vector<128x128xf32>, vector<128x128xf32> -> vector<128x128xf32>
      %c0_5 = arith.constant 0 : index
      %c0_6 = arith.constant 0 : index
      %15 = vector.load %arg8[%c0_5, %c0_6] : memref<128x128xf32, #tpu.memory_space<vmem>>, vector<128x128xf32>
      tpu.vector_store %arg8[%c0_5, %c0_6], %14 {strides = array<i32>} : memref<128x128xf32, #tpu.memory_space<vmem>>, vector<128x128xf32>,
    } else {
    }
    return
  }
  func.func @transform_0(%arg0: i32, %arg1: i32) -> (i32, i32) {
    %c0_i32 = arith.constant 0 : i32
    %0 = arith.cmpi eq, %arg0, %c0_i32 : i32
    %c0_i32_0 = arith.constant 0 : i32
    %1 = arith.select %0, %arg1, %c0_i32_0 : i32
    %c0_i32_1 = arith.constant 0 : i32
    %c0_i32_2 = arith.constant 0 : i32
    return %1, %c0_i32_1 : i32, i32
  }
  func.func @transform_1(%arg0: i32, %arg1: i32) -> (i32, i32) {
    %c0_i32 = arith.constant 0 : i32
    %c0_i32_0 = arith.constant 0 : i32
    %c0_i32_1 = arith.constant 0 : i32
    return %c0_i32, %c0_i32_0 : i32, i32
  }
  func.func @transform_2(%arg0: i32, %arg1: i32) -> (i32, i32) {
    %c0_i32 = arith.constant 0 : i32
    %c0_i32_0 = arith.constant 0 : i32
    %c0_i32_1 = arith.constant 0 : i32
    return %c0_i32, %c0_i32_0 : i32, i32
  }
  func.func @transform_3(%arg0: i32, %arg1: i32) -> (i32, i32) {
    %c0_i32 = arith.constant 0 : i32
    %c0_i32_0 = arith.constant 0 : i32
    %c0_i32_1 = arith.constant 0 : i32
    return %c0_i32, %c0_i32_0 : i32, i32
  }
  func.func @transform_4(%arg0: i32, %arg1: i32) -> (i32, i32) {
    %c0_i32 = arith.constant 0 : i32
    %c0_i32_0 = arith.constant 0 : i32
    %c0_i32_1 = arith.constant 0 : i32
    return %c0_i32, %c0_i32_0 : i32, i32
  }
  func.func @transform_5(%arg0: i32, %arg1: i32) -> (i32, i32) {
    %c0_i32 = arith.constant 0 : i32
    %c0_i32_0 = arith.constant 0 : i32
    %c0_i32_1 = arith.constant 0 : i32
    return %c0_i32, %c0_i32_0 : i32, i32
  }
  func.func @transform_6(%arg0: i32, %arg1: i32) -> (i32, i32) {
    %c2_i32 = arith.constant 2 : i32
    %0 = arith.cmpi eq, %arg0, %c2_i32 : i32
    %c0_i32 = arith.constant 0 : i32
    %1 = arith.select %0, %arg1, %c0_i32 : i32
    %c0_i32_0 = arith.constant 0 : i32
    %c0_i32_1 = arith.constant 0 : i32
    return %1, %c0_i32_0 : i32, i32
  }
}

</mosaic_0001>

<bundles_post_ra>
// kernel: tpu_custom_call.1
= control target key start
LH: loop header
LB: loop body
LE: loop exit
PB: predicated region body
PF: predicated region fallthrough
CT: control target
= control target key end

     0   :  { %6 = vsyncpa [#allocation3], 0  ;;  %s341_s0 = inlined_call_operand.hbm [shape: f32[8,128], index: 0, kind: input, shape index: {}]   ;;  %s342_s1 = inlined_call_operand.hbm [shape: f32[8,128], index: 1, kind: output, shape index: {}]  }
   0x1   :  { %7 = vsyncpa [#allocation4], 0  ;;  %s262_s6 = smov 0  }
   0x2 LB: > { %s145_s7 = sadd.s32 4294967295, %s248_s6   ;;  %p146_p0 = scmp.ge.s32.totalorder %s248_s6, 1  ;;  %s248_s6 = sphi %s262_s6, %s13_s6  }
   0x3   : > { %p60_p1 = scmp.lt.s32.totalorder %s248_s6, 3  ;;  %p276_p3 = scmp.eq.s32.totalorder %s145_s7, 0 }
   0x4   : > { %s250_s10 = smov [#allocation2]   ;;  %s180_s15 = scalar_lea.hbm %s341_s0, 128 }
   0x5   : > { %p270_p2 = pnand %p146_p0, %p60_p1  ;;  %s73_s11 = sshll.u32 %s250_s10, 4  ;;  %s74_s11 = int_to_ptr.vmem [resolvable:$true] %s73_s11 }
   0x6   : > { %s347_s9 = scalar_select %p276_p3, 1, 0 }
   0x7   : > { %s346_s8 = scalar_select %p270_p2, 1, 0 }
   0x8   : > { %p162_p4 = pneg %p270_p2  ;;  %p181_p6 = scmp.ne.s32.totalorder %s341_s0, %s180_s15 }
   0x9   : > { %p187_p10 = scmp.lt.u32.totalorder %s180_s15, %s341_s0 }
   0xa   : > { %p284_p5 = pnand %p276_p3, %p162_p4 }
   0xc   : > { %p182_p7 = pneg %p284_p5 }
   0xe   : > { %p183_p8 = pnand %p182_p7, %p181_p6 }
  0x10   : > { %p184_p9 = pneg %p183_p8 }
  0x12   : > { %p189_p11 = pnand %p187_p10, %p184_p9 }
  0x14   : > { %192 = shalt.err (!%p189_p11)
}
  0x15   : > { %s193_s20 = scalar_lea.vmem %s74_s11, 128  ;;  %p201_p1 = scmp.lt.s32.totalorder %s74_s11, %s74_s11 }
  0x16   : > { %p194_p12 = scmp.ne.s32.totalorder %s74_s11, %s193_s20  ;;  %p202_p4 = scmp.lt.s32.totalorder %s193_s20, %s193_s20 }
  0x18   : > { %p196_p13 = pnand %p194_p12, %p182_p7  ;;  %p203_p3 = por %p202_p4, %p201_p1 }
  0x1a   : > { %p197_p0 = pneg %p196_p13 }
  0x1c   : > { %p204_p2 = pnand %p203_p3, %p197_p0 }
  0x1e   : > { %207 = shalt.err (!%p204_p2)
}
  0x1f   : > { %165 = dma.hbm_to_vmem [thread:$0]  (!%p284_p5), %s341_s0, 128, %s74_s11, [#allocation3]  }
  0x20   : > { %p349_p6 = scmp.ne.s32.totalorder %s346_s8, 0 }
  0x21   : > { %p350_p8 = scmp.ne.s32.totalorder (!%p349_p6), %s347_s9, 0 }
  0x22   : > { %86 = sbr.rel (%p349_p6) target bundleno = 67 (0x43), region = 24 }
  0x29   : > { %239 = dma.done.wait (%p350_p8), [#allocation3], 128  }
  0x2a   : > { %241 = vsyncadd (%p350_p8), [#allocation3], 4294967168  ;;  %s251_s23 = smov [#allocation5]   ;;  %v96_v0 = vld [vmem:[#allocation2] sm:$0xff]  ;;  %p312_p2 = scmp.eq.s32.totalorder %s145_s7, 1 }
  0x2b   : > { %s106_s24 = sshll.u32 %s251_s23, 4  ;;  %v97_v1 = vmul.f32 2.0, %v96_v0  ;;  %s107_s24 = int_to_ptr.vmem [resolvable:$true] %s106_s24 }
  0x2c   : > { %s208_s26 = scalar_lea.vmem %s107_s24, 128  ;;  %p215_p9 = scmp.lt.s32.totalorder %s107_s24, %s107_s24 }
  0x2d   : > { %98 = vst [vmem:[#allocation5] sm:$0xff] %v97_v1  ;;  %p209_p3 = scmp.ne.s32.totalorder %s107_s24, %s208_s26  ;;  %p216_p10 = scmp.lt.s32.totalorder %s208_s26, %s208_s26 }
  0x2f   : > { %p210_p5 = pnand %p209_p3, %p312_p2  ;;  %p217_p11 = por %p216_p10, %p215_p9 }
  0x31   : > { %p211_p7 = pneg %p210_p5 }
  0x33   : > { %p218_p12 = pnand %p217_p11, %p211_p7 }
  0x35   : > { %221 = shalt.err (!%p218_p12)
}
  0x36   : > { %s222_s29 = scalar_lea.hbm %s342_s1, 128 }
  0x37   : > { %p223_p13 = scmp.ne.s32.totalorder %s342_s1, %s222_s29  ;;  %p228_p4 = scmp.lt.u32.totalorder %s222_s29, %s342_s1 }
  0x39   : > { %p224_p0 = pnand %p223_p13, %p312_p2 }
  0x3b   : > { %p225_p1 = pneg %p224_p0 }
  0x3d   : > { %p230_p6 = pnand %p228_p4, %p225_p1 }
  0x3f   : > { %233 = shalt.err (!%p230_p6)
}
  0x40   : > { %159 = dma.vmem_to_hbm [thread:$0]  (%p312_p2), %s107_s24, 128, %s342_s1, [#allocation4]  }
  0x41   : > { %243 = dma.done.wait (%p312_p2), [#allocation4], 128  }
  0x42   : > { %245 = vsyncadd (%p312_p2), [#allocation4], 4294967168 }
  0x43 PF: > { %s13_s6 = sadd.s32 1, %s248_s6  }
  0x44   : > { %p10_p8 = scmp.ge.s32.totalorder %s13_s6, 4  }
  0x46   :  { %12 = sbr.rel (!%p10_p8) target bundleno = 2 (0x2), region = 53 }
  0x4d   :  { %119 = vsyncpa [#allocation3], 1 }
  0x4e   :  { %121 = vsyncpa [#allocation3 + $0x1], 1 }
  0x4f   :  { %122 = vsyncpa [#allocation4], 1 }
  0x50   :  { %124 = vsyncpa [#allocation4 + $0x1], 1 }

// kernel: gcn_forward.1
= control target key start
LH: loop header
LB: loop body
LE: loop exit
PB: predicated region body
PF: predicated region fallthrough
CT: control target
= control target key end

     0   :  { %s1789_s21 = smov 0   ;;  %s1791_s22 = smov 0   ;;  %s2163_s0 = inlined_call_operand.vmem [shape: f32[128,128], index: 0, kind: input, shape index: {}]   ;;  %s2164_s1 = inlined_call_operand.vmem [shape: f32[128,128], index: 1, kind: input, shape index: {}]   ;;  %s2165_s2 = inlined_call_operand.vmem [shape: f32[1,128], index: 2, kind: input, shape index: {}]   ;;  %s2166_s3 = inlined_call_operand.vmem [shape: f32[128,128], index: 3, kind: input, shape index: {}]   ;;  %s2167_s4 = inlined_call_operand.vmem [shape: f32[1,128], index: 4, kind: input, shape index: {}]   ;;  %s2168_s5 = inlined_call_operand.vmem [shape: f32[128,128], index: 5, kind: input, shape index: {}]   ;;  %s2169_s6 = inlined_call_operand.vmem [shape: f32[128,128], index: 6, kind: output, shape index: {}]  }
   0x1   :  { %s1793_s23 = smov 0  }
   0x2 LB: > { %s28_s24 = sadd.s32 1, %s1747_s22  ;;  %p1182_p0 = scmp.ge.s32.totalorder %s1751_s23, 1  ;;  %s1751_s23 = sphi %s1793_s23, %s16_s23   ;;  %s1747_s22 = sphi %s1791_s22, %s2171_s22   ;;  %s1743_s21 = sphi %s1789_s21, %s2170_s21  }
   0x3   : > { %p30_p1 = scmp.ge.s32.totalorder %s28_s24, 3  ;;  %p237_p2 = scmp.lt.s32.totalorder %s1751_s23, 4 }
   0x5   : > { %s2173_s24 = smov (%p30_p1, %s28_s24), 0  ;;  %p238_p3 = pnand %p1182_p0, %p237_p2 }
   0x6   : > { %p1183_p4 = scmp.ne.s32.totalorder (!%p238_p3), %s1743_s21, 0 }
   0x7   : > { %241 = sbr.rel (%p238_p3) target bundleno = 1035 (0x40b), region = 44 }
   0xe   : > { %295 = sbr.rel (%p1183_p4) target bundleno = 277 (0x115), region = 48  ;;  %v312_v0 = vld [vmem:[%s2164_s1] sm:$0xff] (!%p1183_p4)  ;;  %v313_v1 = vld [vmem:[%s2164_s1 + $0x8] sm:$0xff] (!%p1183_p4)  ;;  %v314_v2 = vld [vmem:[%s2164_s1 + $0x10] sm:$0xff] (!%p1183_p4)  ;;  %v1753_v40 = vmov (!%p1183_p4), 0.0  }
   0xf   : > { %v1544_v3 = vpack.c.bf16 (!%p1183_p4), %v313_v1, %v312_v0  ;;  %v315_v4 = vld [vmem:[%s2164_s1 + $0x18] sm:$0xff] (!%p1183_p4)  ;;  %v316_v6 = vld [vmem:[%s2164_s1 + $0x20] sm:$0xff] (!%p1183_p4)  ;;  %v317_v7 = vld [vmem:[%s2164_s1 + $0x28] sm:$0xff] (!%p1183_p4)  ;;  %501 = vst [vmem:[%s2169_s6] sm:$0xff] (!%p1183_p4), %v1753_v40 }
  0x10   : > { %v1548_v5 = vpack.c.bf16 (!%p1183_p4), %v315_v4, %v314_v2  ;;  %v1552_v8 = vpack.c.bf16 (!%p1183_p4), %v317_v7, %v316_v6  ;;  %v296_v9 = vld [vmem:[%s2163_s0] sm:$0xff] (!%p1183_p4)  ;;  %v318_v11 = vld [vmem:[%s2164_s1 + $0x30] sm:$0xff] (!%p1183_p4)  ;;  %v319_v12 = vld [vmem:[%s2164_s1 + $0x38] sm:$0xff] (!%p1183_p4)  ;;  %502 = vst [vmem:[%s2169_s6 + $0x8] sm:$0xff] (!%p1183_p4), %v1753_v40 }
  0x11   : > { %1545 = vmatprep.subr.bf16.mxu0 (!%p1183_p4), %v1544_v3  ;;  %1672 = vmatprep.subr.bf16.mxu1 (!%p1183_p4), %v1544_v3  ;;  %v304_v10 = vld [vmem:[%s2163_s0 + $0x40] sm:$0xff] (!%p1183_p4)  ;;  %v1556_v13 = vpack.c.bf16 (!%p1183_p4), %v319_v12, %v318_v11  ;;  %v321_v15 = vld [vmem:[%s2164_s1 + $0x48] sm:$0xff] (!%p1183_p4)  ;;  %v322_v17 = vld [vmem:[%s2164_s1 + $0x50] sm:$0xff] (!%p1183_p4)  ;;  %503 = vst [vmem:[%s2169_s6 + $0x10] sm:$0xff] (!%p1183_p4), %v1753_v40 }
  0x12   : > { %1547 = vmatpush3.bf16.msra.mxu0 (!%p1183_p4), %v1544_v3  ;;  %1680 = vmatpush3.bf16.msra.mxu1 (!%p1183_p4), %v1544_v3  ;;  %v320_v14 = vld [vmem:[%s2164_s1 + $0x40] sm:$0xff] (!%p1183_p4)  ;;  %v323_v18 = vld [vmem:[%s2164_s1 + $0x58] sm:$0xff] (!%p1183_p4)  ;;  %v325_v21 = vld [vmem:[%s2164_s1 + $0x68] sm:$0xff] (!%p1183_p4)  ;;  %504 = vst [vmem:[%s2169_s6 + $0x18] sm:$0xff] (!%p1183_p4), %v1753_v40 }
  0x13   : > { %1549 = vmatprep.subr.bf16.mxu0 (!%p1183_p4), %v1548_v5  ;;  %1673 = vmatprep.subr.bf16.mxu1 (!%p1183_p4), %v1548_v5  ;;  %v1560_v16 = vpack.c.bf16 (!%p1183_p4), %v321_v15, %v320_v14  ;;  %v1564_v19 = vpack.c.bf16 (!%p1183_p4), %v323_v18, %v322_v17  ;;  %v324_v20 = vld [vmem:[%s2164_s1 + $0x60] sm:$0xff] (!%p1183_p4)  ;;  %v326_v23 = vld [vmem:[%s2164_s1 + $0x70] sm:$0xff] (!%p1183_p4)  ;;  %v327_v24 = vld [vmem:[%s2164_s1 + $0x78] sm:$0xff] (!%p1183_p4)  ;;  %505 = vst [vmem:[%s2169_s6 + $0x20] sm:$0xff] (!%p1183_p4), %v1753_v40 }
  0x14   : > { %1352 = vmatprep.mubr.f32.mxu0 (!%p1183_p4), %v296_v9  ;;  %1364 = vmatprep.mubr.f32.mxu1 (!%p1183_p4), %v304_v10  ;;  %v1568_v22 = vpack.c.bf16 (!%p1183_p4), %v325_v21, %v324_v20  ;;  %v1572_v25 = vpack.c.bf16 (!%p1183_p4), %v327_v24, %v326_v23  ;;  %v297_v26 = vld [vmem:[%s2163_s0 + $0x8] sm:$0xff] (!%p1183_p4)  ;;  %v298_v28 = vld [vmem:[%s2163_s0 + $0x10] sm:$0xff] (!%p1183_p4)  ;;  %v299_v30 = vld [vmem:[%s2163_s0 + $0x18] sm:$0xff] (!%p1183_p4)  ;;  %506 = vst [vmem:[%s2169_s6 + $0x28] sm:$0xff] (!%p1183_p4), %v1753_v40 }
  0x15   : > { %v305_v27 = vld [vmem:[%s2163_s0 + $0x48] sm:$0xff]  ;;  %v306_v29 = vld [vmem:[%s2163_s0 + $0x50] sm:$0xff]  ;;  %v307_v31 = vld [vmem:[%s2163_s0 + $0x58] sm:$0xff]  ;;  %507 = vst [vmem:[%s2169_s6 + $0x30] sm:$0xff] %v1753_v40 }
  0x16   : > { %1551 = vmatpush3.bf16.msra.mxu0 %v1548_v5  ;;  %1681 = vmatpush3.bf16.msra.mxu1 %v1548_v5  ;;  %v300_v32 = vld [vmem:[%s2163_s0 + $0x20] sm:$0xff]  ;;  %v301_v34 = vld [vmem:[%s2163_s0 + $0x28] sm:$0xff]  ;;  %v302_v36 = vld [vmem:[%s2163_s0 + $0x30] sm:$0xff]  ;;  %508 = vst [vmem:[%s2169_s6 + $0x38] sm:$0xff] %v1753_v40 }
  0x17   : > { %1553 = vmatprep.subr.bf16.mxu0 %v1552_v8  ;;  %1674 = vmatprep.subr.bf16.mxu1 %v1552_v8  ;;  %v308_v33 = vld [vmem:[%s2163_s0 + $0x60] sm:$0xff]  ;;  %v309_v35 = vld [vmem:[%s2163_s0 + $0x68] sm:$0xff]  ;;  %v310_v37 = vld [vmem:[%s2163_s0 + $0x70] sm:$0xff]  ;;  %509 = vst [vmem:[%s2169_s6 + $0x40] sm:$0xff] %v1753_v40 }
  0x18   : > { %v303_v38 = vld [vmem:[%s2163_s0 + $0x38] sm:$0xff]  ;;  %510 = vst [vmem:[%s2169_s6 + $0x48] sm:$0xff] %v1753_v40  ;;  %511 = vst [vmem:[%s2169_s6 + $0x50] sm:$0xff] %v1753_v40  ;;  %v1184_v41 = vld [vmem:[%s2165_s2] ss:$0 sm:$0xff] }
  0x19   : > { %v311_v39 = vld [vmem:[%s2163_s0 + $0x78] sm:$0xff]  ;;  %512 = vst [vmem:[%s2169_s6 + $0x58] sm:$0xff] %v1753_v40  ;;  %513 = vst [vmem:[%s2169_s6 + $0x60] sm:$0xff] %v1753_v40 }
  0x1a   : > { %1555 = vmatpush3.bf16.msra.mxu0 %v1552_v8  ;;  %1682 = vmatpush3.bf16.msra.mxu1 %v1552_v8  ;;  %514 = vst [vmem:[%s2169_s6 + $0x68] sm:$0xff] %v1753_v40  ;;  %515 = vst [vmem:[%s2169_s6 + $0x70] sm:$0xff] %v1753_v40 }
  0x1b   : > { %1557 = vmatprep.subr.bf16.mxu0 %v1556_v13  ;;  %1675 = vmatprep.subr.bf16.mxu1 %v1556_v13  ;;  %516 = vst [vmem:[%s2169_s6 + $0x78] sm:$0xff] %v1753_v40 }
  0x1e   : > { %1559 = vmatpush3.bf16.msra.mxu0 %v1556_v13  ;;  %1683 = vmatpush3.bf16.msra.mxu1 %v1556_v13 }
  0x1f   : > { %1561 = vmatprep.subr.bf16.mxu0 %v1560_v16  ;;  %1676 = vmatprep.subr.bf16.mxu1 %v1560_v16 }
  0x22   : > { %1563 = vmatpush3.bf16.msra.mxu0 %v1560_v16  ;;  %1684 = vmatpush3.bf16.msra.mxu1 %v1560_v16 }
  0x23   : > { %1565 = vmatprep.subr.bf16.mxu0 %v1564_v19  ;;  %1677 = vmatprep.subr.bf16.mxu1 %v1564_v19 }
  0x26   : > { %1567 = vmatpush3.bf16.msra.mxu0 %v1564_v19  ;;  %1685 = vmatpush3.bf16.msra.mxu1 %v1564_v19 }
  0x27   : > { %1569 = vmatprep.subr.bf16.mxu0 %v1568_v22  ;;  %1678 = vmatprep.subr.bf16.mxu1 %v1568_v22 }
  0x2a   : > { %1571 = vmatpush3.bf16.msra.mxu0 %v1568_v22  ;;  %1686 = vmatpush3.bf16.msra.mxu1 %v1568_v22 }
  0x2b   : > { %1573 = vmatprep.subr.bf16.mxu0 %v1572_v25  ;;  %1679 = vmatprep.subr.bf16.mxu1 %v1572_v25 }
  0x2e   : > { %1575 = vmatpush3.bf16.msra.mxu0 %v1572_v25  ;;  %1687 = vmatpush3.bf16.msra.mxu1 %v1572_v25 }
  0x31   : > { %1353 = vmatmul.mubr.f32.vlgmr.msra.gmra.mrb[0].mxu0 %v297_v26  ;;  %1365 = vmatmul.mubr.f32.vlgmr.msra.gmra.mrb[0].mxu1 %v305_v27 }
  0x32   : > { %1355 = vmatprep.mubr.f32.mxu0 %v298_v28  ;;  %1367 = vmatprep.mubr.f32.mxu1 %v306_v29 }
  0x35   : > { %1356 = vmatmul.mubr.f32.gmra.mrb[2].mxu0 %v299_v30  ;;  %1368 = vmatmul.mubr.f32.gmra.mrb[2].mxu1 %v307_v31 }
  0x36   : > { %1358 = vmatprep.mubr.f32.mxu0 %v300_v32  ;;  %1370 = vmatprep.mubr.f32.mxu1 %v308_v33 }
  0x39   : > { %1359 = vmatmul.mubr.f32.gmra.mrb[4].mxu0 %v301_v34  ;;  %1371 = vmatmul.mubr.f32.gmra.mrb[4].mxu1 %v309_v35 }
  0x3a   : > { %1361 = vmatprep.mubr.f32.mxu0 %v302_v36  ;;  %1373 = vmatprep.mubr.f32.mxu1 %v310_v37 }
  0x3d   : > { %1362 = vmatmul.mubr.f32.gmra.mrb[6].mxu0 %v303_v38  ;;  %1374 = vmatmul.mubr.f32.gmra.mrb[6].mxu1 %v311_v39 }
 0x104   : > { %v1354_v42 = vpop.f32.mrb[0].mxu0  ;;  %v1366_v43 = vpop.f32.mrb[0].mxu1 }
 0x105   : > { %v407_v44 = vadd.f32 %v1354_v42, %v1184_v41  ;;  %v447_v45 = vadd.f32 %v1366_v43, %v1184_v41  ;;  %v401_v46 = vpop.f32.mrb[1].mxu0  ;;  %v441_v47 = vpop.f32.mrb[1].mxu1 }
 0x106   : > { %v402_v48 = vadd.f32 %v1184_v41, %v401_v46  ;;  %v442_v49 = vadd.f32 %v1184_v41, %v441_v47 }
 0x107   : > { %482 = vst [vmem:[#allocation2 + $0x8] sm:$0xff] %v407_v44  ;;  %490 = vst [vmem:[#allocation2 + $0x48] sm:$0xff] %v447_v45 }
 0x108   : > { %481 = vst [vmem:[#allocation2] sm:$0xff] %v402_v48  ;;  %489 = vst [vmem:[#allocation2 + $0x40] sm:$0xff] %v442_v49  ;;  %v1357_v50 = vpop.f32.mrb[2].mxu0  ;;  %v1369_v51 = vpop.f32.mrb[2].mxu1 }
 0x109   : > { %v417_v52 = vadd.f32 %v1357_v50, %v1184_v41  ;;  %v457_v53 = vadd.f32 %v1369_v51, %v1184_v41  ;;  %v411_v54 = vpop.f32.mrb[3].mxu0  ;;  %v451_v55 = vpop.f32.mrb[3].mxu1 }
 0x10a   : > { %v412_v56 = vadd.f32 %v1184_v41, %v411_v54  ;;  %v452_v57 = vadd.f32 %v1184_v41, %v451_v55 }
 0x10b   : > { %484 = vst [vmem:[#allocation2 + $0x18] sm:$0xff] %v417_v52  ;;  %492 = vst [vmem:[#allocation2 + $0x58] sm:$0xff] %v457_v53 }
 0x10c   : > { %483 = vst [vmem:[#allocation2 + $0x10] sm:$0xff] %v412_v56  ;;  %491 = vst [vmem:[#allocation2 + $0x50] sm:$0xff] %v452_v57  ;;  %v1360_v58 = vpop.f32.mrb[4].mxu0  ;;  %v1372_v59 = vpop.f32.mrb[4].mxu1 }
 0x10d   : > { %v427_v60 = vadd.f32 %v1360_v58, %v1184_v41  ;;  %v467_v61 = vadd.f32 %v1372_v59, %v1184_v41  ;;  %v421_v62 = vpop.f32.mrb[5].mxu0  ;;  %v461_v63 = vpop.f32.mrb[5].mxu1 }
 0x10e   : > { %v422_v0 = vadd.f32 %v1184_v41, %v421_v62  ;;  %v462_v1 = vadd.f32 %v1184_v41, %v461_v63 }
 0x10f   : > { %486 = vst [vmem:[#allocation2 + $0x28] sm:$0xff] %v427_v60  ;;  %494 = vst [vmem:[#allocation2 + $0x68] sm:$0xff] %v467_v61 }
 0x110   : > { %485 = vst [vmem:[#allocation2 + $0x20] sm:$0xff] %v422_v0  ;;  %493 = vst [vmem:[#allocation2 + $0x60] sm:$0xff] %v462_v1  ;;  %v1363_v2 = vpop.f32.mrb[6].mxu0  ;;  %v1375_v3 = vpop.f32.mrb[6].mxu1 }
 0x111   : > { %v437_v4 = vadd.f32 %v1363_v2, %v1184_v41  ;;  %v477_v5 = vadd.f32 %v1375_v3, %v1184_v41  ;;  %v431_v6 = vpop.f32.mrb[7].mxu0  ;;  %v471_v7 = vpop.f32.mrb[7].mxu1 }
 0x112   : > { %v432_v8 = vadd.f32 %v1184_v41, %v431_v6  ;;  %v472_v9 = vadd.f32 %v1184_v41, %v471_v7 }
 0x113   : > { %488 = vst [vmem:[#allocation2 + $0x38] sm:$0xff] %v437_v4  ;;  %496 = vst [vmem:[#allocation2 + $0x78] sm:$0xff] %v477_v5 }
 0x114   : > { %487 = vst [vmem:[#allocation2 + $0x30] sm:$0xff] %v432_v8  ;;  %495 = vst [vmem:[#allocation2 + $0x70] sm:$0xff] %v472_v9 }
 0x115 PF: > { %p1185_p5 = scmp.ne.s32.totalorder %s1743_s21, 1 }
 0x116   : > { %v538_v10 = vld [vmem:[#allocation2] sm:$0xff] (!%p1185_p5)  ;;  %v539_v11 = vld [vmem:[#allocation2 + $0x8] sm:$0xff] (!%p1185_p5)  ;;  %v540_v12 = vld [vmem:[#allocation2 + $0x10] sm:$0xff] (!%p1185_p5) }
 0x117   : > { %520 = sbr.rel (%p1185_p5) target bundleno = 773 (0x305), region = 56  ;;  %v1576_v13 = vpack.c.bf16 (!%p1185_p5), %v539_v11, %v538_v10  ;;  %v541_v14 = vld [vmem:[#allocation2 + $0x18] sm:$0xff] (!%p1185_p5)  ;;  %v542_v16 = vld [vmem:[#allocation2 + $0x20] sm:$0xff] (!%p1185_p5)  ;;  %v543_v17 = vld [vmem:[#allocation2 + $0x28] sm:$0xff] (!%p1185_p5) }
 0x118   : > { %v1580_v15 = vpack.c.bf16 (!%p1185_p5), %v541_v14, %v540_v12  ;;  %v1584_v18 = vpack.c.bf16 (!%p1185_p5), %v543_v17, %v542_v16  ;;  %v522_v19 = vld [vmem:[%s2168_s5] sm:$0xff] (!%p1185_p5)  ;;  %v547_v24 = vld [vmem:[#allocation2 + $0x48] sm:$0xff] (!%p1185_p5)  ;;  %v717_v27 = vld [vmem:[%s2166_s3 + $0x10] sm:$0xff] (!%p1185_p5) }
 0x119   : > { %1577 = vmatprep.subr.bf16.mxu0 (!%p1185_p5), %v1576_v13  ;;  %1408 = vmatprep.mubr.f32.mxu0 (!%p1185_p5), %v522_v19  ;;  %v546_v23 = vld [vmem:[#allocation2 + $0x40] sm:$0xff] (!%p1185_p5)  ;;  %v716_v26 = vld [vmem:[%s2166_s3 + $0x8] sm:$0xff] (!%p1185_p5)  ;;  %v718_v28 = vld [vmem:[%s2166_s3 + $0x18] sm:$0xff] (!%p1185_p5) }
 0x11a   : > { %1579 = vmatpush3.bf16.msra.mxu0 (!%p1185_p5), %v1576_v13  ;;  %v545_v21 = vld [vmem:[#allocation2 + $0x38] sm:$0xff] (!%p1185_p5)  ;;  %v715_v25 = vld [vmem:[%s2166_s3] sm:$0xff] (!%p1185_p5)  ;;  %v1612_v30 = vpack.c.bf16 (!%p1185_p5), %v718_v28, %v717_v27  ;;  %v1592_v31 = vpack.c.bf16 (!%p1185_p5), %v547_v24, %v546_v23  ;;  %v720_v33 = vld [vmem:[%s2166_s3 + $0x28] sm:$0xff] (!%p1185_p5) }
 0x11b   : > { %1581 = vmatprep.subr.bf16.mxu0 (!%p1185_p5), %v1580_v15  ;;  %v544_v20 = vld [vmem:[#allocation2 + $0x30] sm:$0xff] (!%p1185_p5)  ;;  %v1608_v29 = vpack.c.bf16 (!%p1185_p5), %v716_v26, %v715_v25  ;;  %v719_v32 = vld [vmem:[%s2166_s3 + $0x20] sm:$0xff] (!%p1185_p5)  ;;  %v549_v35 = vld [vmem:[#allocation2 + $0x58] sm:$0xff] (!%p1185_p5) }
 0x11c   : > { %v1588_v22 = vpack.c.bf16 (!%p1185_p5), %v545_v21, %v544_v20  ;;  %v548_v34 = vld [vmem:[#allocation2 + $0x50] sm:$0xff] (!%p1185_p5)  ;;  %v1616_v36 = vpack.c.bf16 (!%p1185_p5), %v720_v33, %v719_v32  ;;  %v722_v39 = vld [vmem:[%s2166_s3 + $0x38] sm:$0xff] (!%p1185_p5)  ;;  %v550_v40 = vld [vmem:[#allocation2 + $0x60] sm:$0xff] (!%p1185_p5) }
 0x11d   : > { %1609 = vmatprep.subr.bf16.mxu1 (!%p1185_p5), %v1608_v29  ;;  %v1596_v37 = vpack.c.bf16 (!%p1185_p5), %v549_v35, %v548_v34  ;;  %v721_v38 = vld [vmem:[%s2166_s3 + $0x30] sm:$0xff] (!%p1185_p5)  ;;  %v551_v41 = vld [vmem:[#allocation2 + $0x68] sm:$0xff] (!%p1185_p5)  ;;  %v723_v44 = vld [vmem:[%s2166_s3 + $0x40] sm:$0xff] (!%p1185_p5) }
 0x11e   : > { %1583 = vmatpush3.bf16.msra.mxu0 %v1580_v15  ;;  %1611 = vmatpush3.bf16.msra.mxu1 %v1608_v29  ;;  %v1620_v42 = vpack.c.bf16 %v722_v39, %v721_v38  ;;  %v1600_v43 = vpack.c.bf16 %v551_v41, %v550_v40  ;;  %v724_v45 = vld [vmem:[%s2166_s3 + $0x48] sm:$0xff]  ;;  %v552_v46 = vld [vmem:[#allocation2 + $0x70] sm:$0xff]  ;;  %v553_v47 = vld [vmem:[#allocation2 + $0x78] sm:$0xff] }
 0x11f   : > { %1585 = vmatprep.subr.bf16.mxu0 %v1584_v18  ;;  %1613 = vmatprep.subr.bf16.mxu1 %v1612_v30  ;;  %v1624_v48 = vpack.c.bf16 %v724_v45, %v723_v44  ;;  %v1604_v49 = vpack.c.bf16 %v553_v47, %v552_v46  ;;  %v725_v50 = vld [vmem:[%s2166_s3 + $0x50] sm:$0xff]  ;;  %v726_v51 = vld [vmem:[%s2166_s3 + $0x58] sm:$0xff]  ;;  %v727_v53 = vld [vmem:[%s2166_s3 + $0x60] sm:$0xff] }
 0x120   : > { %v1628_v52 = vpack.c.bf16 %v726_v51, %v725_v50  ;;  %v728_v54 = vld [vmem:[%s2166_s3 + $0x68] sm:$0xff]  ;;  %v524_v57 = vld [vmem:[%s2168_s5 + $0x10] sm:$0xff]  ;;  %v525_v58 = vld [vmem:[%s2168_s5 + $0x18] sm:$0xff] }
 0x121   : > { %v523_v55 = vld [vmem:[%s2168_s5 + $0x8] sm:$0xff]  ;;  %v1632_v56 = vpack.c.bf16 %v728_v54, %v727_v53  ;;  %v526_v59 = vld [vmem:[%s2168_s5 + $0x20] sm:$0xff]  ;;  %v528_v61 = vld [vmem:[%s2168_s5 + $0x30] sm:$0xff] }
 0x122   : > { %1587 = vmatpush3.bf16.msra.mxu0 %v1584_v18  ;;  %1615 = vmatpush3.bf16.msra.mxu1 %v1612_v30  ;;  %v527_v60 = vld [vmem:[%s2168_s5 + $0x28] sm:$0xff]  ;;  %v529_v62 = vld [vmem:[%s2168_s5 + $0x38] sm:$0xff]  ;;  %v530_v63 = vld [vmem:[%s2168_s5 + $0x40] sm:$0xff] }
 0x123   : > { %1589 = vmatprep.subr.bf16.mxu0 %v1588_v22  ;;  %1617 = vmatprep.subr.bf16.mxu1 %v1616_v36  ;;  %v531_v0 = vld [vmem:[%s2168_s5 + $0x48] sm:$0xff]  ;;  %v532_v1 = vld [vmem:[%s2168_s5 + $0x50] sm:$0xff]  ;;  %v533_v2 = vld [vmem:[%s2168_s5 + $0x58] sm:$0xff] }
 0x124   : > { %v534_v3 = vld [vmem:[%s2168_s5 + $0x60] sm:$0xff]  ;;  %v535_v4 = vld [vmem:[%s2168_s5 + $0x68] sm:$0xff]  ;;  %v536_v5 = vld [vmem:[%s2168_s5 + $0x70] sm:$0xff] }
 0x125   : > { %v537_v6 = vld [vmem:[%s2168_s5 + $0x78] sm:$0xff]  ;;  %v729_v7 = vld [vmem:[%s2166_s3 + $0x70] sm:$0xff] }
 0x126   : > { %1591 = vmatpush3.bf16.msra.mxu0 %v1588_v22  ;;  %1619 = vmatpush3.bf16.msra.mxu1 %v1616_v36  ;;  %v730_v8 = vld [vmem:[%s2166_s3 + $0x78] sm:$0xff] }
 0x127   : > { %1593 = vmatprep.subr.bf16.mxu0 %v1592_v31  ;;  %1621 = vmatprep.subr.bf16.mxu1 %v1620_v42  ;;  %v1636_v9 = vpack.c.bf16 %v730_v8, %v729_v7 }
 0x12a   : > { %1595 = vmatpush3.bf16.msra.mxu0 %v1592_v31  ;;  %1623 = vmatpush3.bf16.msra.mxu1 %v1620_v42  ;;  %v1186_v42 = vld [vmem:[%s2167_s4] ss:$0 sm:$0xff] }
 0x12b   : > { %1597 = vmatprep.subr.bf16.mxu0 %v1596_v37  ;;  %1625 = vmatprep.subr.bf16.mxu1 %v1624_v48 }
 0x12e   : > { %1599 = vmatpush3.bf16.msra.mxu0 %v1596_v37  ;;  %1627 = vmatpush3.bf16.msra.mxu1 %v1624_v48 }
 0x12f   : > { %1601 = vmatprep.subr.bf16.mxu0 %v1600_v43  ;;  %1629 = vmatprep.subr.bf16.mxu1 %v1628_v52 }
 0x132   : > { %1603 = vmatpush3.bf16.msra.mxu0 %v1600_v43  ;;  %1631 = vmatpush3.bf16.msra.mxu1 %v1628_v52 }
 0x133   : > { %1605 = vmatprep.subr.bf16.mxu0 %v1604_v49  ;;  %1633 = vmatprep.subr.bf16.mxu1 %v1632_v56 }
 0x136   : > { %1607 = vmatpush3.bf16.msra.mxu0 %v1604_v49  ;;  %1635 = vmatpush3.bf16.msra.mxu1 %v1632_v56 }
 0x137   : > { %1637 = vmatprep.subr.bf16.mxu1 %v1636_v9 }
 0x139   : > { %1409 = vmatmul.mubr.f32.vlgmr.msra.gmra.mrb[0].mxu0 %v523_v55 }
 0x13a   : > { %1411 = vmatprep.mubr.f32.mxu0 %v524_v57  ;;  %1639 = vmatpush3.bf16.msra.mxu1 %v1636_v9 }
 0x13d   : > { %1412 = vmatmul.mubr.f32.gmra.mrb[2].mxu0 %v525_v58 }
 0x13e   : > { %1414 = vmatprep.mubr.f32.mxu0 %v526_v59 }
 0x141   : > { %1415 = vmatmul.mubr.f32.gmra.mrb[4].mxu0 %v527_v60 }
 0x142   : > { %1417 = vmatprep.mubr.f32.mxu0 %v528_v61 }
 0x145   : > { %1418 = vmatmul.mubr.f32.gmra.mrb[6].mxu0 %v529_v62 }
 0x146   : > { %1420 = vmatprep.mubr.f32.mxu0 %v530_v63 }
 0x149   : > { %1421 = vmatmul.mubr.f32.gmra.mrb[8].mxu0 %v531_v0 }
 0x14a   : > { %1423 = vmatprep.mubr.f32.mxu0 %v532_v1 }
 0x14d   : > { %1424 = vmatmul.mubr.f32.gmra.mrb[10].mxu0 %v533_v2 }
 0x14e   : > { %1426 = vmatprep.mubr.f32.mxu0 %v534_v3 }
 0x151   : > { %1427 = vmatmul.mubr.f32.gmra.mrb[12].mxu0 %v535_v4 }
 0x152   : > { %1429 = vmatprep.mubr.f32.mxu0 %v536_v5 }
 0x155   : > { %1430 = vmatmul.mubr.f32.gmra.mrb[14].mxu0 %v537_v6 }
 0x20c   : > { %v1410_v10 = vpop.f32.mrb[0].mxu0 }
 0x20d   : > { %v620_v11 = vpop.f32.mrb[1].mxu0  ;;  %v700_v13 = vmax.f32 %v1410_v10, 0.0 }
 0x20e   : > { %v699_v12 = vmax.f32 %v620_v11, 0.0 }
 0x210   : > { %v1413_v14 = vpop.f32.mrb[2].mxu0  ;;  %1464 = vmatprep.mubr.f32.mxu1 %v699_v12 }
 0x211   : > { %v630_v15 = vpop.f32.mrb[3].mxu0  ;;  %1465 = vmatmul.mubr.f32.vlgmr.msra.gmra.mrb[0].mxu1 %v700_v13  ;;  %v702_v17 = vmax.f32 %v1413_v14, 0.0 }
 0x212   : > { %v701_v16 = vmax.f32 %v630_v15, 0.0 }
 0x214   : > { %v1416_v18 = vpop.f32.mrb[4].mxu0  ;;  %1467 = vmatprep.mubr.f32.mxu1 %v701_v16 }
 0x215   : > { %v640_v19 = vpop.f32.mrb[5].mxu0  ;;  %1468 = vmatmul.mubr.f32.gmra.mrb[2].mxu1 %v702_v17  ;;  %v704_v21 = vmax.f32 %v1416_v18, 0.0 }
 0x216   : > { %v703_v20 = vmax.f32 %v640_v19, 0.0 }
 0x218   : > { %v1419_v22 = vpop.f32.mrb[6].mxu0  ;;  %1470 = vmatprep.mubr.f32.mxu1 %v703_v20 }
 0x219   : > { %v650_v23 = vpop.f32.mrb[7].mxu0  ;;  %1471 = vmatmul.mubr.f32.gmra.mrb[4].mxu1 %v704_v21  ;;  %v706_v25 = vmax.f32 %v1419_v22, 0.0 }
 0x21a   : > { %v705_v24 = vmax.f32 %v650_v23, 0.0 }
 0x21c   : > { %v1422_v26 = vpop.f32.mrb[8].mxu0  ;;  %1473 = vmatprep.mubr.f32.mxu1 %v705_v24 }
 0x21d   : > { %v660_v27 = vpop.f32.mrb[9].mxu0  ;;  %1474 = vmatmul.mubr.f32.gmra.mrb[6].mxu1 %v706_v25  ;;  %v708_v29 = vmax.f32 %v1422_v26, 0.0 }
 0x21e   : > { %v707_v28 = vmax.f32 %v660_v27, 0.0 }
 0x220   : > { %v1425_v30 = vpop.f32.mrb[10].mxu0  ;;  %1476 = vmatprep.mubr.f32.mxu1 %v707_v28 }
 0x221   : > { %v670_v31 = vpop.f32.mrb[11].mxu0  ;;  %1477 = vmatmul.mubr.f32.gmra.mrb[8].mxu1 %v708_v29  ;;  %v710_v33 = vmax.f32 %v1425_v30, 0.0 }
 0x222   : > { %v709_v32 = vmax.f32 %v670_v31, 0.0 }
 0x224   : > { %v1428_v34 = vpop.f32.mrb[12].mxu0  ;;  %1479 = vmatprep.mubr.f32.mxu1 %v709_v32 }
 0x225   : > { %v680_v35 = vpop.f32.mrb[13].mxu0  ;;  %1480 = vmatmul.mubr.f32.gmra.mrb[10].mxu1 %v710_v33  ;;  %v712_v37 = vmax.f32 %v1428_v34, 0.0 }
 0x226   : > { %v711_v36 = vmax.f32 %v680_v35, 0.0 }
 0x228   : > { %v1431_v38 = vpop.f32.mrb[14].mxu0  ;;  %1482 = vmatprep.mubr.f32.mxu1 %v711_v36 }
 0x229   : > { %v690_v39 = vpop.f32.mrb[15].mxu0  ;;  %1483 = vmatmul.mubr.f32.gmra.mrb[12].mxu1 %v712_v37  ;;  %v714_v41 = vmax.f32 %v1431_v38, 0.0 }
 0x22a   : > { %v713_v40 = vmax.f32 %v690_v39, 0.0 }
 0x22c   : > { %1485 = vmatprep.mubr.f32.mxu1 %v713_v40 }
 0x22d   : > { %1486 = vmatmul.mubr.f32.gmra.mrb[14].mxu1 %v714_v41 }
 0x2e4   : > { %v1466_v43 = vpop.f32.mrb[0].mxu1 }
 0x2e5   : > { %v810_v44 = vadd.f32 %v1466_v43, %v1186_v42  ;;  %v804_v45 = vpop.f32.mrb[1].mxu1 }
 0x2e6   : > { %v805_v46 = vadd.f32 %v1186_v42, %v804_v45 }
 0x2e7   : > { %885 = vst [vmem:[#allocation3 + $0x8] sm:$0xff] %v810_v44 }
 0x2e8   : > { %884 = vst [vmem:[#allocation3] sm:$0xff] %v805_v46  ;;  %v1469_v47 = vpop.f32.mrb[2].mxu1 }
 0x2e9   : > { %v820_v48 = vadd.f32 %v1469_v47, %v1186_v42  ;;  %v814_v49 = vpop.f32.mrb[3].mxu1 }
 0x2ea   : > { %v815_v50 = vadd.f32 %v1186_v42, %v814_v49 }
 0x2eb   : > { %887 = vst [vmem:[#allocation3 + $0x18] sm:$0xff] %v820_v48 }
 0x2ec   : > { %886 = vst [vmem:[#allocation3 + $0x10] sm:$0xff] %v815_v50  ;;  %v1472_v51 = vpop.f32.mrb[4].mxu1 }
 0x2ed   : > { %v830_v52 = vadd.f32 %v1472_v51, %v1186_v42  ;;  %v824_v53 = vpop.f32.mrb[5].mxu1 }
 0x2ee   : > { %v825_v54 = vadd.f32 %v1186_v42, %v824_v53 }
 0x2ef   : > { %889 = vst [vmem:[#allocation3 + $0x28] sm:$0xff] %v830_v52 }
 0x2f0   : > { %888 = vst [vmem:[#allocation3 + $0x20] sm:$0xff] %v825_v54  ;;  %v1475_v55 = vpop.f32.mrb[6].mxu1 }
 0x2f1   : > { %v840_v56 = vadd.f32 %v1475_v55, %v1186_v42  ;;  %v834_v57 = vpop.f32.mrb[7].mxu1 }
 0x2f2   : > { %v835_v58 = vadd.f32 %v1186_v42, %v834_v57 }
 0x2f3   : > { %891 = vst [vmem:[#allocation3 + $0x38] sm:$0xff] %v840_v56 }
 0x2f4   : > { %890 = vst [vmem:[#allocation3 + $0x30] sm:$0xff] %v835_v58  ;;  %v1478_v59 = vpop.f32.mrb[8].mxu1 }
 0x2f5   : > { %v850_v60 = vadd.f32 %v1478_v59, %v1186_v42  ;;  %v844_v61 = vpop.f32.mrb[9].mxu1 }
 0x2f6   : > { %v845_v62 = vadd.f32 %v1186_v42, %v844_v61 }
 0x2f7   : > { %893 = vst [vmem:[#allocation3 + $0x48] sm:$0xff] %v850_v60 }
 0x2f8   : > { %892 = vst [vmem:[#allocation3 + $0x40] sm:$0xff] %v845_v62  ;;  %v1481_v63 = vpop.f32.mrb[10].mxu1 }
 0x2f9   : > { %v860_v0 = vadd.f32 %v1481_v63, %v1186_v42  ;;  %v854_v1 = vpop.f32.mrb[11].mxu1 }
 0x2fa   : > { %v855_v2 = vadd.f32 %v1186_v42, %v854_v1 }
 0x2fb   : > { %895 = vst [vmem:[#allocation3 + $0x58] sm:$0xff] %v860_v0 }
 0x2fc   : > { %894 = vst [vmem:[#allocation3 + $0x50] sm:$0xff] %v855_v2  ;;  %v1484_v3 = vpop.f32.mrb[12].mxu1 }
 0x2fd   : > { %v870_v4 = vadd.f32 %v1484_v3, %v1186_v42  ;;  %v864_v5 = vpop.f32.mrb[13].mxu1 }
 0x2fe   : > { %v865_v6 = vadd.f32 %v1186_v42, %v864_v5 }
 0x2ff   : > { %897 = vst [vmem:[#allocation3 + $0x68] sm:$0xff] %v870_v4 }
 0x300   : > { %896 = vst [vmem:[#allocation3 + $0x60] sm:$0xff] %v865_v6  ;;  %v1487_v7 = vpop.f32.mrb[14].mxu1 }
 0x301   : > { %v880_v8 = vadd.f32 %v1487_v7, %v1186_v42  ;;  %v874_v9 = vpop.f32.mrb[15].mxu1 }
 0x302   : > { %v875_v10 = vadd.f32 %v1186_v42, %v874_v9 }
 0x303   : > { %899 = vst [vmem:[#allocation3 + $0x78] sm:$0xff] %v880_v8 }
 0x304   : > { %898 = vst [vmem:[#allocation3 + $0x70] sm:$0xff] %v875_v10 }
 0x305 PF: > { %p1187_p6 = scmp.ne.s32.totalorder %s1743_s21, 2 }
 0x306   : > { %v921_v11 = vld [vmem:[#allocation3] sm:$0xff] (!%p1187_p6)  ;;  %v922_v12 = vld [vmem:[#allocation3 + $0x8] sm:$0xff] (!%p1187_p6)  ;;  %v923_v13 = vld [vmem:[#allocation3 + $0x10] sm:$0xff] (!%p1187_p6) }
 0x307   : > { %903 = sbr.rel (%p1187_p6) target bundleno = 1035 (0x40b), region = 60  ;;  %v1640_v14 = vpack.c.bf16 (!%p1187_p6), %v922_v12, %v921_v11  ;;  %v924_v15 = vld [vmem:[#allocation3 + $0x18] sm:$0xff] (!%p1187_p6)  ;;  %v925_v17 = vld [vmem:[#allocation3 + $0x20] sm:$0xff] (!%p1187_p6)  ;;  %v926_v18 = vld [vmem:[#allocation3 + $0x28] sm:$0xff] (!%p1187_p6) }
 0x308   : > { %v1644_v16 = vpack.c.bf16 (!%p1187_p6), %v924_v15, %v923_v13  ;;  %v1648_v19 = vpack.c.bf16 (!%p1187_p6), %v926_v18, %v925_v17  ;;  %v905_v20 = vld [vmem:[%s2168_s5] sm:$0xff] (!%p1187_p6)  ;;  %v927_v22 = vld [vmem:[#allocation3 + $0x30] sm:$0xff] (!%p1187_p6)  ;;  %v928_v23 = vld [vmem:[#allocation3 + $0x38] sm:$0xff] (!%p1187_p6) }
 0x309   : > { %1641 = vmatprep.subr.bf16.mxu0 (!%p1187_p6), %v1640_v14  ;;  %1688 = vmatprep.subr.bf16.mxu1 (!%p1187_p6), %v1640_v14  ;;  %v913_v21 = vld [vmem:[%s2168_s5 + $0x40] sm:$0xff] (!%p1187_p6)  ;;  %v1652_v24 = vpack.c.bf16 (!%p1187_p6), %v928_v23, %v927_v22  ;;  %v930_v26 = vld [vmem:[#allocation3 + $0x48] sm:$0xff] (!%p1187_p6)  ;;  %v931_v28 = vld [vmem:[#allocation3 + $0x50] sm:$0xff] (!%p1187_p6) }
 0x30a   : > { %1643 = vmatpush3.bf16.msra.mxu0 (!%p1187_p6), %v1640_v14  ;;  %1696 = vmatpush3.bf16.msra.mxu1 (!%p1187_p6), %v1640_v14  ;;  %v929_v25 = vld [vmem:[#allocation3 + $0x40] sm:$0xff] (!%p1187_p6)  ;;  %v932_v29 = vld [vmem:[#allocation3 + $0x58] sm:$0xff] (!%p1187_p6)  ;;  %v934_v32 = vld [vmem:[#allocation3 + $0x68] sm:$0xff] (!%p1187_p6) }
 0x30b   : > { %1645 = vmatprep.subr.bf16.mxu0 (!%p1187_p6), %v1644_v16  ;;  %1689 = vmatprep.subr.bf16.mxu1 (!%p1187_p6), %v1644_v16  ;;  %v1656_v27 = vpack.c.bf16 (!%p1187_p6), %v930_v26, %v929_v25  ;;  %v1660_v30 = vpack.c.bf16 (!%p1187_p6), %v932_v29, %v931_v28  ;;  %v933_v31 = vld [vmem:[#allocation3 + $0x60] sm:$0xff] (!%p1187_p6)  ;;  %v935_v34 = vld [vmem:[#allocation3 + $0x70] sm:$0xff] (!%p1187_p6)  ;;  %v936_v35 = vld [vmem:[#allocation3 + $0x78] sm:$0xff] (!%p1187_p6) }
 0x30c   : > { %1520 = vmatprep.mubr.f32.mxu0 (!%p1187_p6), %v905_v20  ;;  %1532 = vmatprep.mubr.f32.mxu1 (!%p1187_p6), %v913_v21  ;;  %v1664_v33 = vpack.c.bf16 (!%p1187_p6), %v934_v32, %v933_v31  ;;  %v1668_v36 = vpack.c.bf16 (!%p1187_p6), %v936_v35, %v935_v34  ;;  %v906_v37 = vld [vmem:[%s2168_s5 + $0x8] sm:$0xff] (!%p1187_p6)  ;;  %v907_v39 = vld [vmem:[%s2168_s5 + $0x10] sm:$0xff] (!%p1187_p6)  ;;  %v908_v41 = vld [vmem:[%s2168_s5 + $0x18] sm:$0xff] (!%p1187_p6) }
 0x30d   : > { %v914_v38 = vld [vmem:[%s2168_s5 + $0x48] sm:$0xff] (!%p1187_p6)  ;;  %v915_v40 = vld [vmem:[%s2168_s5 + $0x50] sm:$0xff] (!%p1187_p6)  ;;  %v916_v42 = vld [vmem:[%s2168_s5 + $0x58] sm:$0xff] (!%p1187_p6) }
 0x30e   : > { %1647 = vmatpush3.bf16.msra.mxu0 %v1644_v16  ;;  %1697 = vmatpush3.bf16.msra.mxu1 %v1644_v16  ;;  %v909_v43 = vld [vmem:[%s2168_s5 + $0x20] sm:$0xff]  ;;  %v910_v45 = vld [vmem:[%s2168_s5 + $0x28] sm:$0xff]  ;;  %v911_v47 = vld [vmem:[%s2168_s5 + $0x30] sm:$0xff] }
 0x30f   : > { %1649 = vmatprep.subr.bf16.mxu0 %v1648_v19  ;;  %1690 = vmatprep.subr.bf16.mxu1 %v1648_v19  ;;  %v917_v44 = vld [vmem:[%s2168_s5 + $0x60] sm:$0xff]  ;;  %v918_v46 = vld [vmem:[%s2168_s5 + $0x68] sm:$0xff]  ;;  %v919_v48 = vld [vmem:[%s2168_s5 + $0x70] sm:$0xff] }
 0x310   : > { %v912_v49 = vld [vmem:[%s2168_s5 + $0x38] sm:$0xff] }
 0x311   : > { %v920_v50 = vld [vmem:[%s2168_s5 + $0x78] sm:$0xff] }
 0x312   : > { %1651 = vmatpush3.bf16.msra.mxu0 %v1648_v19  ;;  %1698 = vmatpush3.bf16.msra.mxu1 %v1648_v19 }
 0x313   : > { %1653 = vmatprep.subr.bf16.mxu0 %v1652_v24  ;;  %1691 = vmatprep.subr.bf16.mxu1 %v1652_v24 }
 0x316   : > { %1655 = vmatpush3.bf16.msra.mxu0 %v1652_v24  ;;  %1699 = vmatpush3.bf16.msra.mxu1 %v1652_v24 }
 0x317   : > { %1657 = vmatprep.subr.bf16.mxu0 %v1656_v27  ;;  %1692 = vmatprep.subr.bf16.mxu1 %v1656_v27 }
 0x31a   : > { %1659 = vmatpush3.bf16.msra.mxu0 %v1656_v27  ;;  %1700 = vmatpush3.bf16.msra.mxu1 %v1656_v27 }
 0x31b   : > { %1661 = vmatprep.subr.bf16.mxu0 %v1660_v30  ;;  %1693 = vmatprep.subr.bf16.mxu1 %v1660_v30 }
 0x31e   : > { %1663 = vmatpush3.bf16.msra.mxu0 %v1660_v30  ;;  %1701 = vmatpush3.bf16.msra.mxu1 %v1660_v30 }
 0x31f   : > { %1665 = vmatprep.subr.bf16.mxu0 %v1664_v33  ;;  %1694 = vmatprep.subr.bf16.mxu1 %v1664_v33 }
 0x322   : > { %1667 = vmatpush3.bf16.msra.mxu0 %v1664_v33  ;;  %1702 = vmatpush3.bf16.msra.mxu1 %v1664_v33 }
 0x323   : > { %1669 = vmatprep.subr.bf16.mxu0 %v1668_v36  ;;  %1695 = vmatprep.subr.bf16.mxu1 %v1668_v36 }
 0x326   : > { %1671 = vmatpush3.bf16.msra.mxu0 %v1668_v36  ;;  %1703 = vmatpush3.bf16.msra.mxu1 %v1668_v36 }
 0x329   : > { %1521 = vmatmul.mubr.f32.vlgmr.msra.gmra.mrb[0].mxu0 %v906_v37  ;;  %1533 = vmatmul.mubr.f32.vlgmr.msra.gmra.mrb[0].mxu1 %v914_v38 }
 0x32a   : > { %1523 = vmatprep.mubr.f32.mxu0 %v907_v39  ;;  %1535 = vmatprep.mubr.f32.mxu1 %v915_v40 }
 0x32d   : > { %1524 = vmatmul.mubr.f32.gmra.mrb[2].mxu0 %v908_v41  ;;  %1536 = vmatmul.mubr.f32.gmra.mrb[2].mxu1 %v916_v42 }
 0x32e   : > { %1526 = vmatprep.mubr.f32.mxu0 %v909_v43  ;;  %1538 = vmatprep.mubr.f32.mxu1 %v917_v44 }
 0x331   : > { %1527 = vmatmul.mubr.f32.gmra.mrb[4].mxu0 %v910_v45  ;;  %1539 = vmatmul.mubr.f32.gmra.mrb[4].mxu1 %v918_v46 }
 0x332   : > { %1529 = vmatprep.mubr.f32.mxu0 %v911_v47  ;;  %1541 = vmatprep.mubr.f32.mxu1 %v919_v48 }
 0x335   : > { %1530 = vmatmul.mubr.f32.gmra.mrb[6].mxu0 %v912_v49  ;;  %1542 = vmatmul.mubr.f32.gmra.mrb[6].mxu1 %v920_v50 }
 0x3fc   : > { %v1522_v51 = vpop.f32.mrb[0].mxu0  ;;  %v1534_v52 = vpop.f32.mrb[0].mxu1 }
 0x3fd   : > { %1083 = vst [vmem:[%s2169_s6 + $0x8] sm:$0xff] %v1522_v51  ;;  %1091 = vst [vmem:[%s2169_s6 + $0x48] sm:$0xff] %v1534_v52  ;;  %v1003_v53 = vpop.f32.mrb[1].mxu0  ;;  %v1043_v54 = vpop.f32.mrb[1].mxu1 }
 0x3fe   : > { %1082 = vst [vmem:[%s2169_s6] sm:$0xff] %v1003_v53  ;;  %1090 = vst [vmem:[%s2169_s6 + $0x40] sm:$0xff] %v1043_v54 }
 0x400   : > { %v1525_v55 = vpop.f32.mrb[2].mxu0  ;;  %v1537_v56 = vpop.f32.mrb[2].mxu1 }
 0x401   : > { %1085 = vst [vmem:[%s2169_s6 + $0x18] sm:$0xff] %v1525_v55  ;;  %1093 = vst [vmem:[%s2169_s6 + $0x58] sm:$0xff] %v1537_v56  ;;  %v1013_v57 = vpop.f32.mrb[3].mxu0  ;;  %v1053_v58 = vpop.f32.mrb[3].mxu1 }
 0x402   : > { %1084 = vst [vmem:[%s2169_s6 + $0x10] sm:$0xff] %v1013_v57  ;;  %1092 = vst [vmem:[%s2169_s6 + $0x50] sm:$0xff] %v1053_v58 }
 0x404   : > { %v1528_v59 = vpop.f32.mrb[4].mxu0  ;;  %v1540_v60 = vpop.f32.mrb[4].mxu1 }
 0x405   : > { %1087 = vst [vmem:[%s2169_s6 + $0x28] sm:$0xff] %v1528_v59  ;;  %1095 = vst [vmem:[%s2169_s6 + $0x68] sm:$0xff] %v1540_v60  ;;  %v1023_v61 = vpop.f32.mrb[5].mxu0  ;;  %v1063_v62 = vpop.f32.mrb[5].mxu1 }
 0x406   : > { %1086 = vst [vmem:[%s2169_s6 + $0x20] sm:$0xff] %v1023_v61  ;;  %1094 = vst [vmem:[%s2169_s6 + $0x60] sm:$0xff] %v1063_v62 }
 0x408   : > { %v1531_v63 = vpop.f32.mrb[6].mxu0  ;;  %v1543_v0 = vpop.f32.mrb[6].mxu1 }
 0x409   : > { %1089 = vst [vmem:[%s2169_s6 + $0x38] sm:$0xff] %v1531_v63  ;;  %1097 = vst [vmem:[%s2169_s6 + $0x78] sm:$0xff] %v1543_v0  ;;  %v1033_v1 = vpop.f32.mrb[7].mxu0  ;;  %v1073_v2 = vpop.f32.mrb[7].mxu1 }
 0x40a   : > { %1088 = vst [vmem:[%s2169_s6 + $0x30] sm:$0xff] %v1033_v1  ;;  %1096 = vst [vmem:[%s2169_s6 + $0x70] sm:$0xff] %v1073_v2 }
 0x40b PF: > { %s16_s23 = sadd.s32 1, %s1751_s23   ;;  %s2170_s21 = smov %s1747_s22 }
 0x40c   : > { %p13_p7 = scmp.ge.s32.totalorder %s16_s23, 5   ;;  %s2171_s22 = smov %s2173_s24 }
 0x40e   :  { %15 = sbr.rel (!%p13_p7) target bundleno = 2 (0x2), region = 94 }

</bundles_post_ra>
